<compile_context>
chip_gen: v5e
topology: v5e:2x2
jax: 0.10.0
libtpu: 0.0.40
codegen_flags: <defaults>
</compile_context>

<pallas_src>
import jax
import jax.numpy as jnp
from jax import lax
from jax.experimental import pallas as pl
from jax.experimental.pallas import tpu as pltpu

_LANE = 128


def _round_up(n, m):
    return ((n + m - 1) // m) * m


def _vmem_limit_bytes():
    """Per-generation scoped-VMEM limit: ~3/4 of physical VMEM, capped at 100 MiB."""
    try:
        cap = int(pltpu.get_tpu_info().vmem_capacity_bytes)
    except Exception:
        cap = 64 * 1024 * 1024          # conservative default (v7x physical VMEM)
    return min(cap * 3 // 4, 100 * 1024 * 1024)


def _compiler_params(sem, vmem_limit):
    return pltpu.CompilerParams(dimension_semantics=sem,
                                vmem_limit_bytes=vmem_limit)


# ---------------------------------------------------------------------------
# Fused single-pass kernel: whole per-batch-block volume resident in VMEM.
# ---------------------------------------------------------------------------
def _make_fused_se_kernel(Bt, C, Sp, inv_s):
    nchunks = Sp // _LANE

    def kernel(x_ref, w1t_ref, w2t_ref, o_ref):
        # x_ref / o_ref: (Bt, C, Sp) in the input dtype.
        # Pooled sum accumulated in f32 over 128-lane chunks (VPU adds), then a
        # single cross-lane reduce; the bulk tile is never upcast to f32.
        acc = x_ref[:, :, pl.ds(0, _LANE)].astype(jnp.float32)
        if nchunks > 1:
            def body(i, a):
                off = pl.multiple_of(i * _LANE, _LANE)
                return a + x_ref[:, :, pl.ds(off, _LANE)].astype(jnp.float32)
            acc = lax.fori_loop(1, nchunks, body, acc)
        pooled = jnp.sum(acc, axis=-1) * inv_s                      # (Bt, C) f32

        # Tiny excitation MLP (negligible vs. HBM streaming).
        h = jnp.dot(pooled, w1t_ref[...].astype(jnp.float32),
                    preferred_element_type=jnp.float32)
        h = jnp.maximum(h, 0.0)                                     # (Bt, Cr)
        y = jax.nn.sigmoid(jnp.dot(h, w2t_ref[...].astype(jnp.float32),
                                   preferred_element_type=jnp.float32))  # (Bt, C)

        # Scale in the input dtype — no full f32 copy of the tile.
        o_ref[...] = x_ref[...] * y.astype(o_ref.dtype)[:, :, None]

    return kernel


# ---------------------------------------------------------------------------
# Two-pass (tiled) kernels for volumes too big to keep resident.
# ---------------------------------------------------------------------------
def _make_pool_kernel(C, TS):
    nchunks = TS // _LANE

    def kernel(x_ref, sum_ref, acc_ref):
        # x_ref: (C, TS); sum_ref: (C, 1) f32 out; acc_ref: (C, 128) f32 scratch.
        s = pl.program_id(1)

        @pl.when(s == 0)
        def _():
            acc_ref[...] = jnp.zeros_like(acc_ref)

        part = x_ref[:, pl.ds(0, _LANE)].astype(jnp.float32)
        if nchunks > 1:
            def body(i, p):
                off = pl.multiple_of(i * _LANE, _LANE)
                return p + x_ref[:, pl.ds(off, _LANE)].astype(jnp.float32)
            part = lax.fori_loop(1, nchunks, body, part)
        acc_ref[...] += part

        @pl.when(s == pl.num_programs(1) - 1)
        def _():
            sum_ref[...] = jnp.sum(acc_ref[...], axis=-1, keepdims=True)

    return kernel


def _scale_kernel(x_ref, y_ref, o_ref):
    # x_ref / o_ref: (C, TS) in the input dtype; y_ref: (C, 1) f32 scale.
    o_ref[...] = (x_ref[...] * y_ref[...].astype(x_ref.dtype)).astype(o_ref.dtype)


# ---------------------------------------------------------------------------
# Wrapper
# ---------------------------------------------------------------------------
def se_forward(x, w1, w2, *, force_tiled=False, spatial_tile=None):
    """Squeeze-and-Excitation forward.

    x  : (B, C, D, H, W)
    w1 : (C // r, C)  == fc1.weight (PyTorch layout, no bias)
    w2 : (C, C // r)  == fc2.weight (PyTorch layout, no bias)
    """
    B, C, D, H, W = x.shape
    S = D * H * W
    Cr = w1.shape[0]
    itemsize = jnp.dtype(x.dtype).itemsize
    inv_s = 1.0 / float(S)

    vmem_limit = _vmem_limit_bytes()
    data_budget = vmem_limit - 2 * 1024 * 1024       # headroom for weights/scratch

    Sp = _round_up(S, _LANE)                         # lane-dense trailing dim
    per_batch = 4 * C * Sp * itemsize                # in + out, double-buffered

    use_fused = (not force_tiled) and (per_batch <= data_budget)

    if use_fused:
        # ---- single pass: per-batch volume resident; batch-blocked grid ----
        Bt = 1
        for cand in range(B, 0, -1):
            if B % cand == 0 and cand * per_batch <= data_budget:
                Bt = cand
                break
        x2 = x.reshape(B, C, S)
        if Sp != S:
            x2 = jnp.pad(x2, ((0, 0), (0, 0), (0, Sp - S)))

        out2 = pl.pallas_call(
            _make_fused_se_kernel(Bt, C, Sp, inv_s),
            out_shape=jax.ShapeDtypeStruct((B, C, Sp), x.dtype),
            grid=(B // Bt,),
            in_specs=[
                pl.BlockSpec((Bt, C, Sp), lambda b: (b, 0, 0)),
                pl.BlockSpec((C, Cr), lambda b: (0, 0)),     # fc1.weight.T
                pl.BlockSpec((Cr, C), lambda b: (0, 0)),     # fc2.weight.T
            ],
            out_specs=pl.BlockSpec((Bt, C, Sp), lambda b: (b, 0, 0)),
            compiler_params=_compiler_params(("parallel",), vmem_limit),
        )(x2, w1.T, w2.T)
    else:
        # ---- two-pass: stream x in lane-dense spatial tiles ----
        if spatial_tile is None:
            TS = (data_budget // (4 * C * itemsize)) // _LANE * _LANE
            TS = max(_LANE, min(TS, 8192, Sp))
        else:
            assert spatial_tile % _LANE == 0, "spatial_tile must be a multiple of 128"
            TS = spatial_tile
        Sp = _round_up(S, TS)
        n_s = Sp // TS

        x2 = x.reshape(B, C, S)
        if Sp != S:
            x2 = jnp.pad(x2, ((0, 0), (0, 0), (0, Sp - S)))

        # Pass 1: per-(batch, channel) pooled sums (padding is zero -> exact).
        pooled_sum = pl.pallas_call(
            _make_pool_kernel(C, TS),
            out_shape=jax.ShapeDtypeStruct((B, C, 1), jnp.float32),
            grid=(B, n_s),
            in_specs=[pl.BlockSpec((pl.Squeezed(), C, TS), lambda b, s: (b, 0, s))],
            out_specs=pl.BlockSpec((pl.Squeezed(), C, 1), lambda b, s: (b, 0, 0)),
            scratch_shapes=[pltpu.VMEM((C, _LANE), jnp.float32)],
            compiler_params=_compiler_params(("parallel", "arbitrary"), vmem_limit),
        )(x2)

        # Tiny excitation MLP, batched across B as one trivial XLA step.
        pooled = pooled_sum[:, :, 0] * inv_s                          # (B, C) f32
        h = jnp.maximum(pooled @ w1.astype(jnp.float32).T, 0.0)       # (B, Cr)
        y = jax.nn.sigmoid(h @ w2.astype(jnp.float32).T)[:, :, None]  # (B, C, 1)

        # Pass 2: broadcast scale, in the input dtype.
        out2 = pl.pallas_call(
            _scale_kernel,
            out_shape=jax.ShapeDtypeStruct((B, C, Sp), x.dtype),
            grid=(B, n_s),
            in_specs=[
                pl.BlockSpec((pl.Squeezed(), C, TS), lambda b, s: (b, 0, s)),
                pl.BlockSpec((pl.Squeezed(), C, 1), lambda b, s: (b, 0, 0)),
            ],
            out_specs=pl.BlockSpec((pl.Squeezed(), C, TS), lambda b, s: (b, 0, s)),
            compiler_params=_compiler_params(("parallel", "parallel"), vmem_limit),
        )(x2, y)

    if Sp != S:
        out2 = out2[:, :, :S]
    return out2.reshape(B, C, D, H, W)


def se_reference(x, w1, w2):
    """Pure-JAX reference mirroring the PyTorch SE.forward."""
    y = jnp.mean(x.astype(jnp.float32), axis=(2, 3, 4))               # (B, C)
    y = jnp.maximum(y @ w1.astype(jnp.float32).T, 0.0)
    y = jax.nn.sigmoid(y @ w2.astype(jnp.float32).T)
    return (x * y.astype(x.dtype)[:, :, None, None, None]).astype(x.dtype)


if __name__ == "__main__":
    # Small shapes consistent with the module: channel=8, reduction_ratio=4,
    # spatial 8^3 so the flattened spatial axis (512) is lane-dense.
    B, C = 2, 8
    D = H = W = 8
    reduction_ratio = 4
    Cr = C // reduction_ratio

    key = jax.random.PRNGKey(0)
    kx, k1, k2 = jax.random.split(key, 3)

    x = jax.random.normal(kx, (B, C, D, H, W), dtype=jnp.float32)
    w1 = jax.random.normal(k1, (Cr, C), dtype=jnp.float32) * 0.5      # fc1.weight
    w2 = jax.random.normal(k2, (C, Cr), dtype=jnp.float32) * 0.5      # fc2.weight

    ref = se_reference(x, w1, w2)

    # Fused single-pass path (selected automatically for VMEM-resident sizes).
    out = jax.block_until_ready(se_forward(x, w1, w2))
    assert out.shape == x.shape
    assert jnp.allclose(out, ref, atol=1e-4, rtol=1e-4), "fused path mismatch"

    # Two-pass tiled path (the large-volume fallback), exercised explicitly.
    out_t = jax.block_until_ready(
        se_forward(x, w1, w2, force_tiled=True, spatial_tile=128))
    assert jnp.allclose(out_t, ref, atol=1e-4, rtol=1e-4), "tiled path mismatch"

    # Non-multiple-of-128 spatial size exercises the zero-padding path.
    x_small = jax.random.normal(kx, (B, C, 4, 4, 4), dtype=jnp.float32)
    out_s = jax.block_until_ready(se_forward(x_small, w1, w2))
    ref_s = se_reference(x_small, w1, w2)
    assert jnp.allclose(out_s, ref_s, atol=1e-4, rtol=1e-4), "padded path mismatch"

    print("KERNEL_OK")
</pallas_src>

<mosaic_0001>
module attributes {stable_mosaic.version = 11 : i64} {
  func.func @kernel(%arg0: i32, %arg1: memref<2x8x512xf32, #tpu.memory_space<vmem>>, %arg2: memref<8x2xf32, #tpu.memory_space<vmem>>, %arg3: memref<2x8xf32, #tpu.memory_space<vmem>>, %arg4: memref<2x8x512xf32, #tpu.memory_space<vmem>>) attributes {dimension_semantics = [#tpu.dimension_semantics<parallel>], iteration_bounds = array<i64: 1>, scalar_prefetch = 0 : i64, scratch_operands = 0 : i64, tpu.core_type = #tpu.core_type<tc>, window_params = [{transform_indices = @transform_0, window_bounds = array<i64: 2, 8, 512>}, {pipeline_mode = #tpu.pipeline_mode<synchronous>, transform_indices = @transform_1, window_bounds = array<i64: 8, 2>}, {pipeline_mode = #tpu.pipeline_mode<synchronous>, transform_indices = @transform_2, window_bounds = array<i64: 2, 8>}, {transform_indices = @transform_3, window_bounds = array<i64: 2, 8, 512>}]} {
    %c0 = arith.constant 0 : index
    %c0_0 = arith.constant 0 : index
    %c0_1 = arith.constant 0 : index
    %0 = vector.load %arg1[%c0, %c0_0, %c0_1] : memref<2x8x512xf32, #tpu.memory_space<vmem>>, vector<2x8x128xf32>
    %c1_i32 = arith.constant 1 : i32
    %c3_i32 = arith.constant 3 : i32
    %1 = arith.addi %c1_i32, %c3_i32 : i32
    %c1_i32_2 = arith.constant 1 : i32
    %2 = scf.for %arg5 = %c1_i32 to %1 step %c1_i32_2 iter_args(%arg6 = %0) -> (vector<2x8x128xf32>)  : i32 {
      %c128_i32 = arith.constant 128 : i32
      %22 = arith.muli %arg5, %c128_i32 : i32
      %23 = tpu.assume_multiple %22, 128 : i32
      %c0_19 = arith.constant 0 : index
      %c0_20 = arith.constant 0 : index
      %24 = arith.index_cast %23 : i32 to index
      %25 = vector.load %arg1[%c0_19, %c0_20, %24] : memref<2x8x512xf32, #tpu.memory_space<vmem>>, vector<2x8x128xf32>
      %26 = arith.addf %arg6, %25 : vector<2x8x128xf32>
      scf.yield %26 : vector<2x8x128xf32>
    }
    %c3_i32_3 = arith.constant 3 : i32
    %cst = arith.constant dense<0.000000e+00> : vector<2x8xf32>
    %3 = vector.multi_reduction <add>, %2, %cst [2] : vector<2x8x128xf32> to vector<2x8xf32>
    %cst_4 = arith.constant 0.001953125 : f32
    %4 = vector.broadcast %cst_4 : f32 to vector<2x8xf32>
    %5 = arith.mulf %3, %4 : vector<2x8xf32>
    %c0_5 = arith.constant 0 : index
    %c0_6 = arith.constant 0 : index
    %6 = vector.load %arg2[%c0_5, %c0_6] : memref<8x2xf32, #tpu.memory_space<vmem>>, vector<8x2xf32>
    %cst_7 = arith.constant dense<0.000000e+00> : vector<2x2xf32>
    %7 = tpu.matmul %5, %6, %cst_7 {dimension_numbers = #tpu.dot_dimension_numbers<[1], [0], [0], [1], [0, 0, 1, 1], [], []>} : vector<2x8xf32>, vector<8x2xf32>, vector<2x2xf32> -> vector<2x2xf32>
    %cst_8 = arith.constant 0.000000e+00 : f32
    %8 = vector.broadcast %cst_8 : f32 to vector<2x2xf32>
    %9 = arith.maximumf %7, %8 : vector<2x2xf32>
    %c0_9 = arith.constant 0 : index
    %c0_10 = arith.constant 0 : index
    %10 = vector.load %arg3[%c0_9, %c0_10] : memref<2x8xf32, #tpu.memory_space<vmem>>, vector<2x8xf32>
    %cst_11 = arith.constant dense<0.000000e+00> : vector<2x8xf32>
    %11 = tpu.matmul %9, %10, %cst_11 {dimension_numbers = #tpu.dot_dimension_numbers<[1], [0], [0], [1], [0, 0, 1, 1], [], []>} : vector<2x2xf32>, vector<2x8xf32>, vector<2x8xf32> -> vector<2x8xf32>
    %12 = arith.negf %11 : vector<2x8xf32>
    %13 = math.exp %12 : vector<2x8xf32>
    %cst_12 = arith.constant 1.000000e+00 : f32
    %14 = vector.broadcast %cst_12 : f32 to vector<2x8xf32>
    %15 = arith.addf %14, %13 : vector<2x8xf32>
    %16 = arith.divf %14, %15 : vector<2x8xf32>
    %c0_13 = arith.constant 0 : index
    %c0_14 = arith.constant 0 : index
    %c0_15 = arith.constant 0 : index
    %17 = vector.load %arg1[%c0_13, %c0_14, %c0_15] : memref<2x8x512xf32, #tpu.memory_space<vmem>>, vector<2x8x512xf32>
    %18 = vector.shape_cast %16 : vector<2x8xf32> to vector<2x8x1xf32>
    %19 = vector.broadcast %18 : vector<2x8x1xf32> to vector<2x8x512xf32>
    %20 = arith.mulf %17, %19 : vector<2x8x512xf32>
    %c0_16 = arith.constant 0 : index
    %c0_17 = arith.constant 0 : index
    %c0_18 = arith.constant 0 : index
    %21 = vector.load %arg4[%c0_16, %c0_17, %c0_18] : memref<2x8x512xf32, #tpu.memory_space<vmem>>, vector<2x8x512xf32>
    tpu.vector_store %arg4[%c0_16, %c0_17, %c0_18], %20 {strides = array<i32>} : memref<2x8x512xf32, #tpu.memory_space<vmem>>, vector<2x8x512xf32>,
    return
  }
  func.func @transform_0(%arg0: i32) -> (i32, i32, i32) {
    %c0_i32 = arith.constant 0 : i32
    %c0_i32_0 = arith.constant 0 : i32
    %c0_i32_1 = arith.constant 0 : i32
    return %arg0, %c0_i32, %c0_i32_0 : i32, i32, i32
  }
  func.func @transform_1(%arg0: i32) -> (i32, i32) {
    %c0_i32 = arith.constant 0 : i32
    %c0_i32_0 = arith.constant 0 : i32
    %c0_i32_1 = arith.constant 0 : i32
    return %c0_i32, %c0_i32_0 : i32, i32
  }
  func.func @transform_2(%arg0: i32) -> (i32, i32) {
    %c0_i32 = arith.constant 0 : i32
    %c0_i32_0 = arith.constant 0 : i32
    %c0_i32_1 = arith.constant 0 : i32
    return %c0_i32, %c0_i32_0 : i32, i32
  }
  func.func @transform_3(%arg0: i32) -> (i32, i32, i32) {
    %c0_i32 = arith.constant 0 : i32
    %c0_i32_0 = arith.constant 0 : i32
    %c0_i32_1 = arith.constant 0 : i32
    return %arg0, %c0_i32, %c0_i32_0 : i32, i32, i32
  }
}

</mosaic_0001>

<bundles_post_ra>
// kernel: tpu_custom_call.1
= control target key start
LH: loop header
LB: loop body
LE: loop exit
PB: predicated region body
PF: predicated region fallthrough
CT: control target
= control target key end

     0   :  { %8 = vsyncpa [#allocation3], 0  ;;  %s365_s0 = inlined_call_operand.hbm [shape: f32[2,8,512], index: 0, kind: input, shape index: {}]   ;;  %s366_s1 = inlined_call_operand.vmem [shape: f32[8,2], index: 1, kind: input, shape index: {}]   ;;  %s367_s2 = inlined_call_operand.vmem [shape: f32[2,8], index: 2, kind: input, shape index: {}]   ;;  %s368_s3 = inlined_call_operand.hbm [shape: f32[2,8,512], index: 3, kind: output, shape index: {}]  }
   0x1   :  { %9 = vsyncpa [#allocation4], 0  ;;  %s14_s14 = sshll.u32 %s365_s0, 4  ;;  %s323_s15 = smov [#allocation2]   ;;  %s15_s14 = int_to_ptr.hbm [resolvable:$true] %s14_s14 }
   0x2   :  { %s16_s16 = sshll.u32 %s323_s15, 4  ;;  %s324_s17 = smov 512   ;;  %s17_s16 = int_to_ptr.vmem [resolvable:$true] %s16_s16 }
   0x3   :  { %s325_s18 = smov 32  }
   0x4   :  { %22 = dma.hbm_to_vmem [thread:$0]  %s15_s14, 1024, %s17_s16, [#allocation3], %s324_s17, %s324_s17, %s325_s18  }
   0x5   :  { %307 = dma.done.wait [#allocation3], 1024  }
   0x6   :  { %308 = vsyncadd [#allocation3], 4294966272  ;;  %v31_v0 = vld [vmem:[#allocation2] sm:$0xff]   ;;  %s319_s19 = smov 1  }
   0x7   :  { %v32_v1 = vld [vmem:[#allocation2 + $0x20] sm:$0xff]   ;;  %v315_v3 = vmov %v31_v0  }
   0x8   :  { %v311_v2 = vmov %v32_v1  }
   0x9 LB: > { %s207_s0 = sshll.u32 %s321_s19, 7  ;;  %s38_s19 = sadd.s32 1, %s321_s19   ;;  %s321_s19 = sphi %s319_s19, %s38_s19   ;;  %v317_v3 = vphi %v315_v3, %v316_v3   ;;  %v313_v2 = vphi %v311_v2, %v312_v2  }
   0xa   : > { %s42_s20 = sshra.s32 %s207_s0, 7  ;;  %p35_p0 = scmp.ge.s32.totalorder %s38_s19, 4  }
   0xb   : > { %s208_s21 = sshll.u32 %s42_s20, 3  ;;  %v56_v8 = vld [vmem:[%s366_s1] sm:$0xff] (%p35_p0)  ;;  %v59_v10 = vlaneseq (%p35_p0)  ;;  %vm63_vm0 = vcmask (%p35_p0), 1041409   ;;  %vm65_vm1 = vcmask (%p35_p0), 64512   ;;  %vm94_vm2 = vcmask (%p35_p0), 1041408   ;;  %v138_v39 = vld [vmem:[#allocation2 + $0x8] sm:$0xff] (%p35_p0) }
   0xc   : > { %s45_s22 = scalar_lea.vmem [#allocation2], %s208_s21  ;;  %83 = vmatpush.msra.mxu0 (%p35_p0), %v56_v8  ;;  %v89_v18 = vld [vmem:[%s367_s2] sm:$0x3] (%p35_p0)  ;;  %vm90_vm3 = vcmask (%p35_p0), 15360   ;;  %v139_v40 = vld [vmem:[#allocation2 + $0x10] sm:$0xff] (%p35_p0)  ;;  %v140_v41 = vld [vmem:[#allocation2 + $0x18] sm:$0xff] (%p35_p0) }
   0xd   : > { %v46_v4 = vld [vmem:[%s45_s22] sm:$0xff]  ;;  %37 = sbr.rel (!%p35_p0) target bundleno = 9 (0x9), region = 44  ;;  %v60_v12 = vand.u32 (%p35_p0), 127, %v59_v10  ;;  %210 = vmatpush.msk.msra.mxu1 (%p35_p0), %vm94_vm2, %v89_v18  ;;  %v147_v21 = vshrl.u32 (%p35_p0), %v59_v10, 7  ;;  %v142_v48 = vld [vmem:[#allocation2 + $0x28] sm:$0xff] (%p35_p0)  ;;  %v143_v49 = vld [vmem:[#allocation2 + $0x30] sm:$0xff] (%p35_p0) }
   0xe   : > { %v47_v5 = vld [vmem:[%s45_s22 + $0x20] sm:$0xff]  ;;  %v48_v6 = vadd.f32 %v317_v3, %v46_v4   ;;  %v144_v50 = vld [vmem:[#allocation2 + $0x38] sm:$0xff] (%p35_p0)  ;;  %s326_s1 = smov (%p35_p0), [#allocation5]   ;;  %s181_s29 = sshll.u32 (%p35_p0), %s368_s3, 4  ;;  %s182_s29 = int_to_ptr.hbm [resolvable:$true] %s181_s29 }
   0xf   : > { %v49_v7 = vadd.f32 %v313_v2, %v47_v5   ;;  %241 = vset.pattern.permute.xlu1 (%p35_p0), %v147_v21  ;;  %242 = vset.pattern.permute.xlu0 (%p35_p0), %v147_v21  ;;  %v137_v38 = vld [vmem:[#allocation2] sm:$0xff] (%p35_p0)  ;;  %s179_s2 = sshll.u32 (%p35_p0), %s326_s1, 4  ;;  %s180_s2 = int_to_ptr.vmem [resolvable:$true] %s179_s2 }
  0x10   : > { %v316_v3 = vmov %v48_v6   ;;  %50 = vadd.xlane.f32.xlu0 (%p35_p0), %v48_v6  ;;  %v141_v47 = vld [vmem:[#allocation2 + $0x20] sm:$0xff] (%p35_p0) }
  0x11   : > { %v312_v2 = vmov %v49_v7  }
  0x18   :  { %52 = vadd.xlane.f32.xlu0 %v49_v7 }
  0x83   :  { %v51_v9 = vpop.xlane.xlu0 %50 }
  0x84   :  { %v54_v11 = vmul.f32 0.001953125, %v51_v9 }
  0x86   :  { %v61_v15 = vperm.slane %v54_v11, %v60_v12 }
  0x8b   :  { %v53_v13 = vpop.xlane.xlu0 %52 }
  0x8c   :  { %v55_v14 = vmul.f32 0.001953125, %v53_v13 }
  0x8e   :  { %v62_v16 = vperm.slane %v55_v14, %v60_v12 }
  0x90   :  { %v64_v17 = vsel %vm63_vm0, %v62_v16, %v61_v15 }
  0x91   :  { %209 = vmatmul.msk.f32.vlgmr.msra.gmra.mxu0 %vm65_vm1, %v64_v17 }
 0x10e   :  { %v85_v19 = vpop.f32.mrf.mxu0 }
 0x10f   :  { %v88_v20 = vmax.f32 %v85_v19, 0.0 }
 0x111   :  { %211 = vmatmul.msk.f32.vlgmr.msra.gmra.mxu1 %vm90_vm3, %v88_v20 }
 0x18e   :  { %v115_v22 = vpop.f32.mrf.mxu1 }
 0x18f   :  { %v212_v23 = vmul.f32 -1.442695, %v115_v22 }
 0x191   :  { %243 = vpow2.f32 %v212_v23 }
 0x197   :  { %v244_v24 = vpop.eup %243 }
 0x198   :  { %v121_v25 = vadd.f32 1.0, %v244_v24 }
 0x19a   :  { %245 = vrcp.f32 %v121_v25  ;;  %v133_v29 = vand.u32 2147483648, %v121_v25  ;;  %v131_v31 = vand.u32 2147483647, %v121_v25  ;;  %vm127_vm5 = vweird.f32 %v121_v25 }
 0x19c   :  { %v134_v33 = vor.u32 1.1754944e-38, %v133_v29  ;;  %vm132_vm7 = vcmp.eq.f32.partialorder %v131_v31, 8.507059e+37 }
 0x1a0   :  { %v246_v26 = vpop.eup %245 }
 0x1a1   :  { %v123_v27 = vmul.f32 %v246_v26, %v121_v25  ;;  %vm128_vm4 = vweird.f32 %v246_v26 }
 0x1a2   :  { %vm129_vm6 = vmor %vm127_vm5, %vm128_vm4 }
 0x1a3   :  { %v124_v28 = vsub.f32 1.0, %v123_v27 }
 0x1a5   :  { %v125_v30 = vmul.f32 %v246_v26, %v124_v28 }
 0x1a7   :  { %v126_v32 = vadd.f32 %v246_v26, %v125_v30 }
 0x1a9   :  { %v130_v34 = vsel %vm129_vm6, %v246_v26, %v126_v32 }
 0x1aa   :  { %v135_v35 = vsel %vm132_vm7, %v134_v33, %v130_v34 }
 0x1ab   :  { %v145_v36 = vperm.slane %v135_v35, 0  ;;  %v152_v37 = vperm.slane %v135_v35, 1 }
 0x1ad   :  { %150 = vperm.xlu1 %241, %v145_v36  }
 0x1b5   :  { %157 = vperm.xlu1 %241, %v152_v37  }
 0x21f   :  { %v151_v42 = vpop.permute.xlu1 %150 }
 0x220   :  { %v159_v43 = vmul.f32 %v151_v42, %v137_v38  ;;  %v160_v44 = vmul.f32 %v151_v42, %v138_v39  ;;  %v161_v45 = vmul.f32 %v151_v42, %v139_v40  ;;  %v162_v46 = vmul.f32 %v151_v42, %v140_v41 }
 0x222   :  { %167 = vst [vmem:[#allocation5] sm:$0xff] %v159_v43 }
 0x223   :  { %168 = vst [vmem:[#allocation5 + $0x8] sm:$0xff] %v160_v44 }
 0x224   :  { %169 = vst [vmem:[#allocation5 + $0x10] sm:$0xff] %v161_v45 }
 0x225   :  { %170 = vst [vmem:[#allocation5 + $0x18] sm:$0xff] %v162_v46 }
 0x227   :  { %v158_v51 = vpop.permute.xlu1 %157 }
 0x228   :  { %v163_v52 = vmul.f32 %v158_v51, %v141_v47  ;;  %v164_v53 = vmul.f32 %v158_v51, %v142_v48  ;;  %v165_v54 = vmul.f32 %v158_v51, %v143_v49  ;;  %v166_v55 = vmul.f32 %v158_v51, %v144_v50 }
 0x22a   :  { %171 = vst [vmem:[#allocation5 + $0x20] sm:$0xff] %v163_v52 }
 0x22b   :  { %172 = vst [vmem:[#allocation5 + $0x28] sm:$0xff] %v164_v53 }
 0x22c   :  { %173 = vst [vmem:[#allocation5 + $0x30] sm:$0xff] %v165_v54 }
 0x22d   :  { %174 = vst [vmem:[#allocation5 + $0x38] sm:$0xff] %v166_v55 }
 0x22e   :  { %187 = dma.vmem_to_hbm [thread:$0]  %s180_s2, 1024, %s182_s29, [#allocation4], %s324_s17, %s324_s17, %s325_s18  }
 0x22f   :  { %309 = dma.done.wait [#allocation4], 1024  }
 0x230   :  { %310 = vsyncadd [#allocation4], 4294966272 }
 0x231   :  { %192 = vsyncpa [#allocation3], 1 }
 0x232   :  { %193 = vsyncpa [#allocation4], 1 }

</bundles_post_ra>
